<compile_context>
chip_gen: v7x
topology: tpu7x:2x2x1
jax: 0.10.0
libtpu: 0.0.40
codegen_flags: <defaults>
</compile_context>

<pallas_src>
import functools

import jax
import jax.numpy as jnp
from jax.experimental import pallas as pl
from jax.experimental.pallas import tpu as pltpu

PAD = 128          # lane width of the packed parameter buffer (max layer width)
ROWS = PAD + 8     # 128 weight rows + 1 bias row + 7 zero rows (sublane aligned)
NUM_LAYERS = 4


def _round_up(a, b):
    return (a + b - 1) // b * b


def _cdiv(a, b):
    return (a + b - 1) // b


def _actor_kernel(p_ref, x_ref, o_ref, *, in_size, out_size):
    # p_ref: [4, ROWS, 128]  packed params (weight rows 0..127, bias row 128)
    # x_ref: [tb, in_size]   natural-width activations
    # o_ref: [tb, out_size]  natural-width output
    h = x_ref[...]
    # Layer 0 contracts over the real fan-in only (remaining W1 rows are zero).
    w0 = p_ref[0, :in_size, :]                 # [in_size, 128]
    b0 = p_ref[0, PAD:PAD + 1, :]              # [1, 128]
    h = jnp.maximum(jnp.dot(h, w0, preferred_element_type=jnp.float32) + b0, 0.0)
    for layer in range(1, NUM_LAYERS):
        w = p_ref[layer, :PAD, :]              # [128, 128]
        b = p_ref[layer, PAD:PAD + 1, :]       # [1, 128]
        h = jnp.maximum(jnp.dot(h, w, preferred_element_type=jnp.float32) + b, 0.0)
    # Only the first `out_size` lanes are valid; narrow (masked) store.
    o_ref[...] = h[:, :out_size]


def pack_actor_params(params):
    """Pack the 4 (W, b) pairs into one zero-padded [4, ROWS, 128] buffer."""
    packed = jnp.zeros((NUM_LAYERS, ROWS, PAD), jnp.float32)
    for i in range(NUM_LAYERS):
        w = params[f"w{i + 1}"]                # [fan_in, fan_out]
        b = params[f"b{i + 1}"]                # [1, fan_out]
        fan_in, fan_out = w.shape
        assert fan_in <= PAD and fan_out <= PAD
        packed = packed.at[i, :fan_in, :fan_out].set(w)
        packed = packed.at[i, PAD, :fan_out].set(b[0])
    return packed


def actor_forward(x, packed_params, out_size, *, batch_tile=1024):
    """x: [B, input_size] f32; packed_params: [4, ROWS, 128] from pack_actor_params."""
    B, in_size = x.shape
    assert in_size <= PAD and out_size <= PAD

    # Sublane-align layer-0's contraction width if needed (<= 7 extra lanes,
    # exact because the packed weight rows beyond fan_in are zero).
    in_size_pad = _round_up(in_size, 8)
    if in_size_pad != in_size:
        x = jnp.pad(x, ((0, 0), (0, in_size_pad - in_size)))

    # Balanced, sublane-aligned batch tile (avoid a mostly-padding last tile).
    n_tiles = max(1, _cdiv(B, batch_tile))
    tb = _round_up(_cdiv(B, n_tiles), 8)
    b_pad = _round_up(B, tb)
    if b_pad != B:
        x = jnp.pad(x, ((0, b_pad - B), (0, 0)))

    grid = (b_pad // tb,)
    flops = 2 * b_pad * (in_size_pad * 32 + 32 * 64 + 64 * 128 + 128 * out_size)
    bytes_accessed = 4 * (packed_params.size + b_pad * in_size_pad + b_pad * out_size)

    kernel = functools.partial(_actor_kernel, in_size=in_size_pad, out_size=out_size)

    out = pl.pallas_call(
        kernel,
        out_shape=jax.ShapeDtypeStruct((b_pad, out_size), jnp.float32),
        grid=grid,
        in_specs=[
            # Single packed-parameter DMA; constant index_map => fetched once,
            # VMEM-resident across all grid steps.
            pl.BlockSpec((NUM_LAYERS, ROWS, PAD), lambda i: (0, 0, 0)),
            # Batch-tiled, natural-width activations (last dim == full dim).
            pl.BlockSpec((tb, in_size_pad), lambda i: (i, 0)),
        ],
        out_specs=pl.BlockSpec((tb, out_size), lambda i: (i, 0)),
        compiler_params=pltpu.CompilerParams(
            dimension_semantics=("parallel",)),
        cost_estimate=pl.CostEstimate(
            flops=flops, transcendentals=0, bytes_accessed=bytes_accessed),
    )(packed_params, x)

    return out[:B] if b_pad != B else out


def init_actor_params(key, input_size, output_size):
    """Deterministic init mimicking nn.Linear's uniform(-1/sqrt(fan_in), +)."""
    sizes = [(input_size, 32), (32, 64), (64, 128), (128, output_size)]
    params = {}
    for i, (fan_in, fan_out) in enumerate(sizes, start=1):
        key, kw, kb = jax.random.split(key, 3)
        bound = 1.0 / jnp.sqrt(jnp.float32(fan_in))
        # Stored as [in, out] == transpose of PyTorch's [out, in] weight.
        params[f"w{i}"] = jax.random.uniform(
            kw, (fan_in, fan_out), jnp.float32, -bound, bound)
        params[f"b{i}"] = jax.random.uniform(
            kb, (1, fan_out), jnp.float32, -bound, bound)
    return params


def actor_reference(x, params):
    """Plain-JAX reference (matches the PyTorch forward: ReLU after every fc)."""
    h = x
    for i in range(1, 5):
        h = jnp.maximum(h @ params[f"w{i}"] + params[f"b{i}"], 0.0)
    return h


if __name__ == "__main__":
    key = jax.random.PRNGKey(0)
    key, kx, kp = jax.random.split(key, 3)

    batch = 8
    input_size = 16
    output_size = 8

    x = jax.random.normal(kx, (batch, input_size), dtype=jnp.float32)
    params = init_actor_params(kp, input_size, output_size)
    packed = pack_actor_params(params)

    out = actor_forward(x, packed, output_size)
    out = jax.block_until_ready(out)

    ref = actor_reference(x, params)
    assert out.shape == (batch, output_size)
    assert jnp.allclose(out, ref, atol=1e-5, rtol=1e-5)

    print("KERNEL_OK")
</pallas_src>

<mosaic_0001>
module attributes {stable_mosaic.version = 11 : i64} {
  func.func @_actor_kernel(%arg0: i32, %arg1: memref<4x136x128xf32, #tpu.memory_space<vmem>>, %arg2: memref<8x16xf32, #tpu.memory_space<vmem>>, %arg3: memref<8x8xf32, #tpu.memory_space<vmem>>) attributes {dimension_semantics = [#tpu.dimension_semantics<parallel>], iteration_bounds = array<i64: 1>, scalar_prefetch = 0 : i64, scratch_operands = 0 : i64, tpu.core_type = #tpu.core_type<tc>, window_params = [{pipeline_mode = #tpu.pipeline_mode<synchronous>, transform_indices = @transform_0, window_bounds = array<i64: 4, 136, 128>}, {transform_indices = @transform_1, window_bounds = array<i64: 8, 16>}, {transform_indices = @transform_2, window_bounds = array<i64: 8, 8>}]} {
    %c0 = arith.constant 0 : index
    %c0_0 = arith.constant 0 : index
    %0 = vector.load %arg2[%c0, %c0_0] : memref<8x16xf32, #tpu.memory_space<vmem>>, vector<8x16xf32>
    %c0_1 = arith.constant 0 : index
    %c0_2 = arith.constant 0 : index
    %c0_3 = arith.constant 0 : index
    %1 = vector.load %arg1[%c0_1, %c0_2, %c0_3] : memref<4x136x128xf32, #tpu.memory_space<vmem>>, vector<1x16x128xf32>
    %2 = vector.shape_cast %1 : vector<1x16x128xf32> to vector<16x128xf32>
    %c0_4 = arith.constant 0 : index
    %c128 = arith.constant 128 : index
    %c0_5 = arith.constant 0 : index
    %3 = vector.load %arg1[%c0_4, %c128, %c0_5] : memref<4x136x128xf32, #tpu.memory_space<vmem>>, vector<1x1x128xf32>
    %4 = vector.shape_cast %3 : vector<1x1x128xf32> to vector<1x128xf32>
    %cst = arith.constant dense<0.000000e+00> : vector<8x128xf32>
    %5 = tpu.matmul %0, %2, %cst {dimension_numbers = #tpu.dot_dimension_numbers<[1], [0], [0], [1], [0, 0, 1, 1], [], []>} : vector<8x16xf32>, vector<16x128xf32>, vector<8x128xf32> -> vector<8x128xf32>
    %6 = vector.broadcast %4 : vector<1x128xf32> to vector<8x128xf32>
    %7 = arith.addf %5, %6 : vector<8x128xf32>
    %cst_6 = arith.constant 0.000000e+00 : f32
    %8 = vector.broadcast %cst_6 : f32 to vector<8x128xf32>
    %9 = arith.maximumf %7, %8 : vector<8x128xf32>
    %c1 = arith.constant 1 : index
    %c0_7 = arith.constant 0 : index
    %c0_8 = arith.constant 0 : index
    %10 = vector.load %arg1[%c1, %c0_7, %c0_8] : memref<4x136x128xf32, #tpu.memory_space<vmem>>, vector<1x128x128xf32>
    %11 = vector.shape_cast %10 : vector<1x128x128xf32> to vector<128x128xf32>
    %c1_9 = arith.constant 1 : index
    %c128_10 = arith.constant 128 : index
    %c0_11 = arith.constant 0 : index
    %12 = vector.load %arg1[%c1_9, %c128_10, %c0_11] : memref<4x136x128xf32, #tpu.memory_space<vmem>>, vector<1x1x128xf32>
    %13 = vector.shape_cast %12 : vector<1x1x128xf32> to vector<1x128xf32>
    %cst_12 = arith.constant dense<0.000000e+00> : vector<8x128xf32>
    %14 = tpu.matmul %9, %11, %cst_12 {dimension_numbers = #tpu.dot_dimension_numbers<[1], [0], [0], [1], [0, 0, 1, 1], [], []>} : vector<8x128xf32>, vector<128x128xf32>, vector<8x128xf32> -> vector<8x128xf32>
    %15 = vector.broadcast %13 : vector<1x128xf32> to vector<8x128xf32>
    %16 = arith.addf %14, %15 : vector<8x128xf32>
    %cst_13 = arith.constant 0.000000e+00 : f32
    %17 = vector.broadcast %cst_13 : f32 to vector<8x128xf32>
    %18 = arith.maximumf %16, %17 : vector<8x128xf32>
    %c2 = arith.constant 2 : index
    %c0_14 = arith.constant 0 : index
    %c0_15 = arith.constant 0 : index
    %19 = vector.load %arg1[%c2, %c0_14, %c0_15] : memref<4x136x128xf32, #tpu.memory_space<vmem>>, vector<1x128x128xf32>
    %20 = vector.shape_cast %19 : vector<1x128x128xf32> to vector<128x128xf32>
    %c2_16 = arith.constant 2 : index
    %c128_17 = arith.constant 128 : index
    %c0_18 = arith.constant 0 : index
    %21 = vector.load %arg1[%c2_16, %c128_17, %c0_18] : memref<4x136x128xf32, #tpu.memory_space<vmem>>, vector<1x1x128xf32>
    %22 = vector.shape_cast %21 : vector<1x1x128xf32> to vector<1x128xf32>
    %cst_19 = arith.constant dense<0.000000e+00> : vector<8x128xf32>
    %23 = tpu.matmul %18, %20, %cst_19 {dimension_numbers = #tpu.dot_dimension_numbers<[1], [0], [0], [1], [0, 0, 1, 1], [], []>} : vector<8x128xf32>, vector<128x128xf32>, vector<8x128xf32> -> vector<8x128xf32>
    %24 = vector.broadcast %22 : vector<1x128xf32> to vector<8x128xf32>
    %25 = arith.addf %23, %24 : vector<8x128xf32>
    %cst_20 = arith.constant 0.000000e+00 : f32
    %26 = vector.broadcast %cst_20 : f32 to vector<8x128xf32>
    %27 = arith.maximumf %25, %26 : vector<8x128xf32>
    %c3 = arith.constant 3 : index
    %c0_21 = arith.constant 0 : index
    %c0_22 = arith.constant 0 : index
    %28 = vector.load %arg1[%c3, %c0_21, %c0_22] : memref<4x136x128xf32, #tpu.memory_space<vmem>>, vector<1x128x128xf32>
    %29 = vector.shape_cast %28 : vector<1x128x128xf32> to vector<128x128xf32>
    %c3_23 = arith.constant 3 : index
    %c128_24 = arith.constant 128 : index
    %c0_25 = arith.constant 0 : index
    %30 = vector.load %arg1[%c3_23, %c128_24, %c0_25] : memref<4x136x128xf32, #tpu.memory_space<vmem>>, vector<1x1x128xf32>
    %31 = vector.shape_cast %30 : vector<1x1x128xf32> to vector<1x128xf32>
    %cst_26 = arith.constant dense<0.000000e+00> : vector<8x128xf32>
    %32 = tpu.matmul %27, %29, %cst_26 {dimension_numbers = #tpu.dot_dimension_numbers<[1], [0], [0], [1], [0, 0, 1, 1], [], []>} : vector<8x128xf32>, vector<128x128xf32>, vector<8x128xf32> -> vector<8x128xf32>
    %33 = vector.broadcast %31 : vector<1x128xf32> to vector<8x128xf32>
    %34 = arith.addf %32, %33 : vector<8x128xf32>
    %cst_27 = arith.constant 0.000000e+00 : f32
    %35 = vector.broadcast %cst_27 : f32 to vector<8x128xf32>
    %36 = arith.maximumf %34, %35 : vector<8x128xf32>
    %37 = vector.extract_strided_slice %36 {offsets = [0, 0], sizes = [8, 8], strides = [1, 1]} : vector<8x128xf32> to vector<8x8xf32>
    %c0_28 = arith.constant 0 : index
    %c0_29 = arith.constant 0 : index
    %38 = vector.load %arg3[%c0_28, %c0_29] : memref<8x8xf32, #tpu.memory_space<vmem>>, vector<8x8xf32>
    tpu.vector_store %arg3[%c0_28, %c0_29], %37 {strides = array<i32>} : memref<8x8xf32, #tpu.memory_space<vmem>>, vector<8x8xf32>,
    return
  }
  func.func @transform_0(%arg0: i32) -> (i32, i32, i32) {
    %c0_i32 = arith.constant 0 : i32
    %c0_i32_0 = arith.constant 0 : i32
    %c0_i32_1 = arith.constant 0 : i32
    %c0_i32_2 = arith.constant 0 : i32
    return %c0_i32, %c0_i32_0, %c0_i32_1 : i32, i32, i32
  }
  func.func @transform_1(%arg0: i32) -> (i32, i32) {
    %c0_i32 = arith.constant 0 : i32
    %c0_i32_0 = arith.constant 0 : i32
    return %arg0, %c0_i32 : i32, i32
  }
  func.func @transform_2(%arg0: i32) -> (i32, i32) {
    %c0_i32 = arith.constant 0 : i32
    %c0_i32_0 = arith.constant 0 : i32
    return %arg0, %c0_i32 : i32, i32
  }
}

</mosaic_0001>

<bundles_post_ra>
// kernel: tpu_custom_call.1
= control target key start
LH: loop header
LB: loop body
LE: loop exit
PB: predicated region body
PF: predicated region fallthrough
CT: control target
= control target key end

     0   :  { %7 = vsyncpa [#allocation3], 0  ;;  %s836_s0 = inlined_call_operand.hbm [shape: f32[4,136,128], index: 0, kind: input, shape index: {}]   ;;  %s837_s1 = inlined_call_operand.hbm [shape: f32[8,16], index: 1, kind: input, shape index: {}]   ;;  %s838_s2 = inlined_call_operand.hbm [shape: f32[8,8], index: 2, kind: output, shape index: {}]  }
   0x1   :  { %8 = vsyncpa [#allocation6], 0 }
   0x2   :  { %9 = vsyncpa [#allocation4], 0  ;;  %s744_s9 = smov [#allocation2]   ;;  %s672_s13 = scalar_lea.hbm %s836_s0, 8704 }
   0x3   :  { %s15_s10 = sshll.u32 %s744_s9, 4  ;;  %p673_p0 = scmp.ne.s32.totalorder %s836_s0, %s672_s13  ;;  %s16_s10 = int_to_ptr.vmem [resolvable:$true] %s15_s10 }
   0x4   :  { %p676_p1 = scmp.lt.u32.totalorder %s672_s13, %s836_s0 }
   0x6   :  { %p678_p2 = pnand %p676_p1, %p673_p0 }
   0x8   :  { %681 = shalt.err (!%p678_p2)
}
   0x9   :  { %s682_s18 = scalar_lea.vmem %s16_s10, 8704  ;;  %p687_p4 = scmp.lt.s32.totalorder %s16_s10, %s16_s10 }
   0xa   :  { %p683_p3 = scmp.ne.s32.totalorder %s16_s10, %s682_s18  ;;  %p688_p5 = scmp.lt.s32.totalorder %s682_s18, %s682_s18 }
   0xc   :  { %p689_p6 = por %p688_p5, %p687_p4 }
   0xe   :  { %p690_p7 = pnand %p689_p6, %p683_p3 }
  0x10   :  { %693 = shalt.err (!%p690_p7)
}
  0x11   :  { %s745_s19 = smov 128   ;;  %s746_s20 = smov 8  }
  0x12   :  { %21 = dma.hbm_to_vmem [thread:$0]  %s836_s0, 8704, %s16_s10, [#allocation3], %s745_s19, %s745_s19, %s746_s20  }
  0x13   :  { %s747_s23 = smov [#allocation5]   ;;  %s694_s27 = scalar_lea.hbm %s837_s1, 128 }
  0x14   :  { %s28_s24 = sshll.u32 %s747_s23, 4  ;;  %p695_p8 = scmp.ne.s32.totalorder %s837_s1, %s694_s27  ;;  %s29_s24 = int_to_ptr.vmem [resolvable:$true] %s28_s24 }
  0x15   :  { %p698_p9 = scmp.lt.u32.totalorder %s694_s27, %s837_s1 }
  0x17   :  { %p700_p10 = pnand %p698_p9, %p695_p8 }
  0x19   :  { %703 = shalt.err (!%p700_p10)
}
  0x1a   :  { %s704_s4 = scalar_lea.vmem %s29_s24, 128  ;;  %p709_p12 = scmp.lt.s32.totalorder %s29_s24, %s29_s24 }
  0x1b   :  { %p705_p11 = scmp.ne.s32.totalorder %s29_s24, %s704_s4  ;;  %p710_p13 = scmp.lt.s32.totalorder %s704_s4, %s704_s4 }
  0x1d   :  { %p711_p0 = por %p710_p13, %p709_p12 }
  0x1f   :  { %p712_p1 = pnand %p711_p0, %p705_p11 }
  0x21   :  { %715 = shalt.err (!%p712_p1)
}
  0x22   :  { %31 = dma.hbm_to_vmem [thread:$0]  %s837_s1, 128, %s29_s24, [#allocation6]  }
  0x23   :  { %738 = dma.done.wait [#allocation3], 8704  }
  0x24   :  { %739 = vsyncadd [#allocation3], 4294958592 }
  0x25   :  { %740 = dma.done.wait [#allocation6], 128  }
  0x26   :  { %741 = vsyncadd [#allocation6], 4294967168  ;;  %v748_v0 = vmov 0.0|0.0   ;;  %vm749_vm0 = vmmov 0   ;;  %v750_v1 = vmov 0.0   ;;  %v39_v2 = vld [vmem:[#allocation2] sm:$0xff] }
  0x27   :  { %589 = vmatprep.subr.bf16.mxu0 %v748_v0  ;;  %481 = vmatprep.mubr.msk.f32.mxu0 %vm749_vm0, %v750_v1  ;;  %v40_v3 = vld [vmem:[#allocation2 + $0x8] sm:$0xff]  ;;  %v123_v6 = vld [vmem:[#allocation2 + $0x90] sm:$0xff]  ;;  %v124_v7 = vld [vmem:[#allocation2 + $0x98] sm:$0xff]  ;;  %vm46_vm1 = vcmask 130048   ;;  %s751_s1 = smov [#allocation7]   ;;  %vm400_vm2 = vcmask 64512  }
  0x28   :  { %592 = vmatprep.subr.bf16.mxu1 %v748_v0  ;;  %516 = vmatprep.mubr.msk.f32.mxu1 %vm749_vm0, %v750_v1  ;;  %v590_v4 = vpack.c.bf16 %v40_v3, %v39_v2  ;;  %v122_v5 = vld [vmem:[#allocation2 + $0x88] sm:$0xff]  ;;  %v125_v9 = vld [vmem:[#allocation2 + $0xa0] sm:$0xff]  ;;  %v127_v13 = vld [vmem:[#allocation2 + $0xb0] sm:$0xff]  ;;  %s408_s6 = sshll.u32 %s751_s1, 4  ;;  %s409_s6 = int_to_ptr.vmem [resolvable:$true] %s408_s6 }
  0x29   :  { %v593_v8 = vpack.c.bf16 %v123_v6, %v122_v5  ;;  %v38_v10 = vld [vmem:[#allocation5] sm:$0xff]  ;;  %v596_v11 = vpack.c.bf16 %v125_v9, %v124_v7  ;;  %v126_v12 = vld [vmem:[#allocation2 + $0xa8] sm:$0xff]  ;;  %v128_v15 = vld [vmem:[#allocation2 + $0xb8] sm:$0xff]  ;;  %s716_s7 = scalar_lea.vmem %s409_s6, 128  ;;  %p721_p3 = scmp.lt.s32.totalorder %s409_s6, %s409_s6 }
  0x2a   :  { %591 = vmatpush3.bf16.msra.mxu0 %v590_v4  ;;  %v599_v14 = vpack.c.bf16 %v127_v13, %v126_v12  ;;  %v129_v16 = vld [vmem:[#allocation2 + $0xc0] sm:$0xff]  ;;  %v130_v18 = vld [vmem:[#allocation2 + $0xc8] sm:$0xff]  ;;  %v131_v19 = vld [vmem:[#allocation2 + $0xd0] sm:$0xff]  ;;  %p717_p2 = scmp.ne.s32.totalorder %s409_s6, %s716_s7  ;;  %p722_p4 = scmp.lt.s32.totalorder %s716_s7, %s716_s7 }
  0x2b   :  { %594 = vmatpush3.bf16.msra.mxu1 %v593_v8  ;;  %616 = vmatprep.subr.bf16.mxu0 %v748_v0  ;;  %v602_v17 = vpack.c.bf16 %v129_v16, %v128_v15  ;;  %v605_v20 = vpack.c.bf16 %v131_v19, %v130_v18  ;;  %v132_v21 = vld [vmem:[#allocation2 + $0xd8] sm:$0xff]  ;;  %v133_v22 = vld [vmem:[#allocation2 + $0xe0] sm:$0xff]  ;;  %v134_v24 = vld [vmem:[#allocation2 + $0xe8] sm:$0xff] }
  0x2c   :  { %595 = vmatprep.subr.bf16.mxu1 %v748_v0  ;;  %v608_v23 = vpack.c.bf16 %v133_v22, %v132_v21  ;;  %v135_v25 = vld [vmem:[#allocation2 + $0xf0] sm:$0xff]  ;;  %v136_v27 = vld [vmem:[#allocation2 + $0xf8] sm:$0xff]  ;;  %v137_v28 = vld [vmem:[#allocation2 + $0x100] sm:$0xff]  ;;  %p723_p5 = por %p722_p4, %p721_p3 }
  0x2d   :  { %482 = vmatmul.mubr.msk.f32.vlgmr.msra.gmra.mrb[0].mxu0 %vm46_vm1, %v38_v10  ;;  %v611_v26 = vpack.c.bf16 %v135_v25, %v134_v24  ;;  %v614_v29 = vpack.c.bf16 %v137_v28, %v136_v27  ;;  %v215_v30 = vld [vmem:[#allocation2 + $0x110] sm:$0xff]  ;;  %v216_v31 = vld [vmem:[#allocation2 + $0x118] sm:$0xff]  ;;  %v217_v32 = vld [vmem:[#allocation2 + $0x120] sm:$0xff] }
  0x2e   :  { %551 = vmatprep.mubr.msk.f32.mxu0 %vm749_vm0, %v750_v1  ;;  %v617_v33 = vpack.c.bf16 %v216_v31, %v215_v30  ;;  %v218_v34 = vld [vmem:[#allocation2 + $0x128] sm:$0xff]  ;;  %v219_v36 = vld [vmem:[#allocation2 + $0x130] sm:$0xff]  ;;  %v220_v37 = vld [vmem:[#allocation2 + $0x138] sm:$0xff]  ;;  %p724_p6 = pnand %p723_p5, %p717_p2 }
  0x2f   :  { %597 = vmatpush3.bf16.msra.mxu1 %v596_v11  ;;  %v620_v35 = vpack.c.bf16 %v218_v34, %v217_v32  ;;  %v623_v38 = vpack.c.bf16 %v220_v37, %v219_v36  ;;  %v221_v39 = vld [vmem:[#allocation2 + $0x140] sm:$0xff]  ;;  %v222_v40 = vld [vmem:[#allocation2 + $0x148] sm:$0xff]  ;;  %v223_v42 = vld [vmem:[#allocation2 + $0x150] sm:$0xff] }
  0x30   :  { %598 = vmatprep.subr.bf16.mxu1 %v748_v0  ;;  %618 = vmatpush3.bf16.msra.mxu0 %v617_v33  ;;  %v626_v41 = vpack.c.bf16 %v222_v40, %v221_v39  ;;  %v224_v43 = vld [vmem:[#allocation2 + $0x158] sm:$0xff]  ;;  %v225_v45 = vld [vmem:[#allocation2 + $0x160] sm:$0xff]  ;;  %v226_v46 = vld [vmem:[#allocation2 + $0x168] sm:$0xff] }
  0x31   :  { %619 = vmatprep.subr.bf16.mxu0 %v748_v0  ;;  %v629_v44 = vpack.c.bf16 %v224_v43, %v223_v42  ;;  %v632_v47 = vpack.c.bf16 %v226_v46, %v225_v45  ;;  %v227_v48 = vld [vmem:[#allocation2 + $0x170] sm:$0xff]  ;;  %v228_v49 = vld [vmem:[#allocation2 + $0x178] sm:$0xff]  ;;  %v418_v51 = vld [vmem:[#allocation2 + $0x80] ss:$0 sm:$0xff] }
  0x32   :  { %v635_v50 = vpack.c.bf16 %v228_v49, %v227_v48  ;;  %v229_v56 = vld [vmem:[#allocation2 + $0x180] sm:$0xff]  ;;  %v230_v57 = vld [vmem:[#allocation2 + $0x188] sm:$0xff]  ;;  %v308_v59 = vld [vmem:[#allocation2 + $0x198] sm:$0xff] }
  0x33   :  { %600 = vmatpush3.bf16.msra.mxu1 %v599_v14  ;;  %v638_v58 = vpack.c.bf16 %v230_v57, %v229_v56  ;;  %v309_v60 = vld [vmem:[#allocation2 + $0x1a0] sm:$0xff]  ;;  %v310_v61 = vld [vmem:[#allocation2 + $0x1a8] sm:$0xff]  ;;  %v311_v63 = vld [vmem:[#allocation2 + $0x1b0] sm:$0xff] }
  0x34   :  { %601 = vmatprep.subr.bf16.mxu1 %v748_v0  ;;  %621 = vmatpush3.bf16.msra.mxu0 %v620_v35  ;;  %v641_v62 = vpack.c.bf16 %v309_v60, %v308_v59  ;;  %v644_v2 = vpack.c.bf16 %v311_v63, %v310_v61  ;;  %v312_v3 = vld [vmem:[#allocation2 + $0x1b8] sm:$0xff]  ;;  %v313_v4 = vld [vmem:[#allocation2 + $0x1c0] sm:$0xff]  ;;  %v315_v6 = vld [vmem:[#allocation2 + $0x1d0] sm:$0xff] }
  0x35   :  { %622 = vmatprep.subr.bf16.mxu0 %v748_v0  ;;  %v647_v5 = vpack.c.bf16 %v313_v4, %v312_v3  ;;  %v316_v8 = vld [vmem:[#allocation2 + $0x1d8] sm:$0xff]  ;;  %v317_v9 = vld [vmem:[#allocation2 + $0x1e0] sm:$0xff]  ;;  %v318_v11 = vld [vmem:[#allocation2 + $0x1e8] sm:$0xff] }
  0x36   :  { %v653_v10 = vpack.c.bf16 %v317_v9, %v316_v8  ;;  %v319_v12 = vld [vmem:[#allocation2 + $0x1f0] sm:$0xff]  ;;  %v320_v14 = vld [vmem:[#allocation2 + $0x1f8] sm:$0xff]  ;;  %v321_v15 = vld [vmem:[#allocation2 + $0x200] sm:$0xff] }
  0x37   :  { %603 = vmatpush3.bf16.msra.mxu1 %v602_v17  ;;  %v656_v13 = vpack.c.bf16 %v319_v12, %v318_v11  ;;  %v659_v16 = vpack.c.bf16 %v321_v15, %v320_v14  ;;  %v420_v17 = vld [vmem:[#allocation2 + $0x108] ss:$0 sm:$0xff]  ;;  %v421_v25 = vld [vmem:[#allocation2 + $0x190] ss:$0 sm:$0xff]  ;;  %v422_v30 = vld [vmem:[#allocation2 + $0x218] ss:$0 sm:$0xff] }
  0x38   :  { %604 = vmatprep.subr.bf16.mxu1 %v748_v0  ;;  %624 = vmatpush3.bf16.msra.mxu0 %v623_v38  ;;  %v322_v22 = vld [vmem:[#allocation2 + $0x208] sm:$0xff] }
  0x39   :  { %625 = vmatprep.subr.bf16.mxu0 %v748_v0 }
  0x3b   :  { %606 = vmatpush3.bf16.msra.mxu1 %v605_v20 }
  0x3c   :  { %607 = vmatprep.subr.bf16.mxu1 %v748_v0  ;;  %627 = vmatpush3.bf16.msra.mxu0 %v626_v41 }
  0x3d   :  { %628 = vmatprep.subr.bf16.mxu0 %v748_v0 }
  0x3f   :  { %609 = vmatpush3.bf16.msra.mxu1 %v608_v23  ;;  %v323_v23 = vld [vmem:[#allocation2 + $0x210] sm:$0xff] }
  0x40   :  { %610 = vmatprep.subr.bf16.mxu1 %v748_v0  ;;  %630 = vmatpush3.bf16.msra.mxu0 %v629_v44  ;;  %v662_v24 = vpack.c.bf16 %v323_v23, %v322_v22 }
  0x41   :  { %631 = vmatprep.subr.bf16.mxu0 %v748_v0 }
  0x43   :  { %612 = vmatpush3.bf16.msra.mxu1 %v611_v26 }
  0x44   :  { %613 = vmatprep.subr.bf16.mxu1 %v748_v0  ;;  %633 = vmatpush3.bf16.msra.mxu0 %v632_v47 }
  0x45   :  { %634 = vmatprep.subr.bf16.mxu0 %v748_v0 }
  0x47   :  { %615 = vmatpush3.bf16.msra.mxu1 %v614_v29 }
  0x48   :  { %640 = vmatprep.subr.bf16.mxu1 %v748_v0  ;;  %636 = vmatpush3.bf16.msra.mxu0 %v635_v50 }
  0x49   :  { %637 = vmatprep.subr.bf16.mxu0 %v748_v0 }
  0x4c   :  { %639 = vmatpush3.bf16.msra.mxu0 %v638_v58 }
 0x100   :  { %v116_v52 = vpop.f32.mrb[0].mxu0 }
 0x101   :  { %v117_v53 = vadd.f32 %v418_v51, %v116_v52  ;;  %v483_v54 = vpop.f32.mrb[1].mxu0 }
 0x103   :  { %v120_v55 = vmax.f32 %v117_v53, 0.0 }
 0x105   :  { %517 = vmatmul.mubr.f32.vlgmr.msra.gmra.mrb[0].mxu1 %v120_v55 }
 0x106   :  { %586 = vmatprep.mubr.msk.f32.mxu1 %vm749_vm0, %v750_v1  ;;  %642 = vmatpush3.bf16.msra.mxu1 %v641_v62  ;;  %v314_v1 = vld [vmem:[#allocation2 + $0x1c8] sm:$0xff] }
 0x107   :  { %643 = vmatprep.subr.bf16.mxu1 %v748_v0  ;;  %v650_v7 = vpack.c.bf16 %v315_v6, %v314_v1 }
 0x10a   :  { %645 = vmatpush3.bf16.msra.mxu1 %v644_v2 }
 0x10b   :  { %646 = vmatprep.subr.bf16.mxu1 %v748_v0 }
 0x10e   :  { %648 = vmatpush3.bf16.msra.mxu1 %v647_v5 }
 0x10f   :  { %649 = vmatprep.subr.bf16.mxu1 %v748_v0 }
 0x112   :  { %651 = vmatpush3.bf16.msra.mxu1 %v650_v7 }
 0x113   :  { %652 = vmatprep.subr.bf16.mxu1 %v748_v0 }
 0x116   :  { %654 = vmatpush3.bf16.msra.mxu1 %v653_v10 }
 0x117   :  { %655 = vmatprep.subr.bf16.mxu1 %v748_v0 }
 0x11a   :  { %657 = vmatpush3.bf16.msra.mxu1 %v656_v13 }
 0x11b   :  { %658 = vmatprep.subr.bf16.mxu1 %v748_v0 }
 0x11e   :  { %660 = vmatpush3.bf16.msra.mxu1 %v659_v16 }
 0x11f   :  { %661 = vmatprep.subr.bf16.mxu1 %v748_v0 }
 0x122   :  { %663 = vmatpush3.bf16.msra.mxu1 %v662_v24 }
 0x1d8   :  { %v209_v18 = vpop.f32.mrb[0].mxu1 }
 0x1d9   :  { %v210_v19 = vadd.f32 %v420_v17, %v209_v18  ;;  %v518_v20 = vpop.f32.mrb[1].mxu1 }
 0x1db   :  { %v213_v21 = vmax.f32 %v210_v19, 0.0 }
 0x1dd   :  { %552 = vmatmul.mubr.f32.vlgmr.msra.gmra.mrb[2].mxu0 %v213_v21 }
 0x2b0   :  { %v302_v26 = vpop.f32.mrb[2].mxu0 }
 0x2b1   :  { %v303_v27 = vadd.f32 %v421_v25, %v302_v26  ;;  %v553_v28 = vpop.f32.mrb[3].mxu0 }
 0x2b3   :  { %v306_v29 = vmax.f32 %v303_v27, 0.0 }
 0x2b5   :  { %587 = vmatmul.mubr.f32.vlgmr.msra.gmra.mrb[2].mxu1 %v306_v29 }
 0x388   :  { %v395_v31 = vpop.f32.mrb[2].mxu1 }
 0x389   :  { %v396_v0 = vadd.f32 %v422_v30, %v395_v31  ;;  %v588_v32 = vpop.f32.mrb[3].mxu1 }
 0x38b   :  { %v399_v33 = vmax.f32 %v396_v0, 0.0 }
 0x38d   :  { %401 = vst.msk [vmem:[#allocation7] sm:$0xff] %vm400_vm2, %v399_v33 }
 0x38e   :  { %727 = shalt.err (!%p724_p6)
}
 0x38f   :  { %s728_s10 = scalar_lea.hbm %s838_s2, 128 }
 0x390   :  { %p729_p7 = scmp.ne.s32.totalorder %s838_s2, %s728_s10  ;;  %p732_p8 = scmp.lt.u32.totalorder %s728_s10, %s838_s2 }
 0x392   :  { %p734_p9 = pnand %p732_p8, %p729_p7 }
 0x394   :  { %737 = shalt.err (!%p734_p9)
}
 0x395   :  { %411 = dma.vmem_to_hbm [thread:$0]  %s409_s6, 128, %s838_s2, [#allocation4]  }
 0x396   :  { %742 = dma.done.wait [#allocation4], 128  }
 0x397   :  { %743 = vsyncadd [#allocation4], 4294967168 }
 0x398   :  { %415 = vsyncpa [#allocation3], 1 }
 0x399   :  { %416 = vsyncpa [#allocation6], 1 }
 0x39a   :  { %417 = vsyncpa [#allocation4], 1 }

</bundles_post_ra>
